<compile_context>
chip_gen: v6e
topology: v6e:2x2x1
jax: 0.10.0
libtpu: 0.0.40
codegen_flags: <defaults>
</compile_context>

<pallas_src>
import jax
import jax.numpy as jnp
from jax.experimental import pallas as pl


def _learnable_params_kernel(p_ref, const_ref, o_ref):
    # p_ref:     (1, n)  learnable params
    # const_ref: (2, n)  row 0 = min_values, row 1 = (max_values - min_values)
    p = p_ref[...]
    mn = const_ref[0:1, :]
    rng = const_ref[1:2, :]
    # sigmoid = 1 / (1 + exp(-p)); exp rides the EUP, blend on the VPU.
    # Safe in f32: exp(-p) -> inf gives sigmoid 0, the correct limit.
    sig = 1.0 / (1.0 + jnp.exp(-p))
    o_ref[...] = mn + rng * sig


def make_learnable_params_forward(min_values, max_values):
    """Builds forward() with the constant min/(max-min) packing done once at init."""
    mn = jnp.asarray(min_values, jnp.float32).reshape(1, -1)
    mx = jnp.asarray(max_values, jnp.float32).reshape(1, -1)
    const = jnp.concatenate([mn, mx - mn], axis=0)  # (2, n), built once at init
    n = const.shape[1]
    assert n <= 128, "single-vreg kernel assumes n <= 128"

    @jax.jit
    def forward(learnable_params):
        # Only per-call pre-kernel op: metadata-only reshape (n,) -> (1, n).
        p = learnable_params.astype(jnp.float32).reshape(1, n)
        out = pl.pallas_call(
            _learnable_params_kernel,
            out_shape=jax.ShapeDtypeStruct((1, n), jnp.float32),
            # Full-extent blocks (== array dims): exempt from (8,128) rule,
            # Pallas pads the VMEM tiles internally. Single shot, no grid.
            in_specs=[
                pl.BlockSpec((1, n), lambda: (0, 0)),
                pl.BlockSpec((2, n), lambda: (0, 0)),
            ],
            out_specs=pl.BlockSpec((1, n), lambda: (0, 0)),
        )(p, const)
        return out[0]

    return forward


if __name__ == "__main__":
    key = jax.random.PRNGKey(0)
    # torch.rand(3) equivalent: uniform [0, 1)
    learnable_params = jax.random.uniform(key, (3,), dtype=jnp.float32)
    min_values = jnp.array([0.1, 0.1, 0.1], dtype=jnp.float32)
    max_values = jnp.array([13.0, 15.0, 50.0], dtype=jnp.float32)

    forward = make_learnable_params_forward(min_values, max_values)
    out = jax.block_until_ready(forward(learnable_params))

    # Reference check in plain JAX
    ref = min_values + (max_values - min_values) * jax.nn.sigmoid(learnable_params)
    assert out.shape == (3,)
    assert jnp.allclose(out, ref, atol=1e-5, rtol=1e-5)

    print("KERNEL_OK")
</pallas_src>

<mosaic_0001>
module attributes {stable_mosaic.version = 11 : i64} {
  func.func @_learnable_params_kernel(%arg0: memref<1x3xf32, #tpu.memory_space<vmem>>, %arg1: memref<2x3xf32, #tpu.memory_space<vmem>>, %arg2: memref<1x3xf32, #tpu.memory_space<vmem>>) attributes {dimension_semantics = [], scalar_prefetch = 0 : i64, scratch_operands = 0 : i64, tpu.core_type = #tpu.core_type<tc>} {
    %c0 = arith.constant 0 : index
    %c0_0 = arith.constant 0 : index
    %0 = vector.load %arg0[%c0, %c0_0] : memref<1x3xf32, #tpu.memory_space<vmem>>, vector<1x3xf32>
    %c0_1 = arith.constant 0 : index
    %c0_2 = arith.constant 0 : index
    %1 = vector.load %arg1[%c0_1, %c0_2] : memref<2x3xf32, #tpu.memory_space<vmem>>, vector<1x3xf32>
    %c1 = arith.constant 1 : index
    %c0_3 = arith.constant 0 : index
    %2 = vector.load %arg1[%c1, %c0_3] : memref<2x3xf32, #tpu.memory_space<vmem>>, vector<1x3xf32>
    %cst = arith.constant 0.000000e+00 : f32
    %3 = vector.broadcast %cst : f32 to vector<1x3xf32>
    %4 = arith.subf %3, %0 : vector<1x3xf32>
    %5 = math.exp %4 : vector<1x3xf32>
    %cst_4 = arith.constant 1.000000e+00 : f32
    %6 = vector.broadcast %cst_4 : f32 to vector<1x3xf32>
    %7 = arith.addf %6, %5 : vector<1x3xf32>
    %cst_5 = arith.constant 1.000000e+00 : f32
    %8 = vector.broadcast %cst_5 : f32 to vector<1x3xf32>
    %9 = arith.divf %8, %7 : vector<1x3xf32>
    %10 = arith.mulf %2, %9 : vector<1x3xf32>
    %11 = arith.addf %1, %10 : vector<1x3xf32>
    %c0_6 = arith.constant 0 : index
    %c0_7 = arith.constant 0 : index
    %12 = vector.load %arg2[%c0_6, %c0_7] : memref<1x3xf32, #tpu.memory_space<vmem>>, vector<1x3xf32>
    tpu.vector_store %arg2[%c0_6, %c0_7], %11 {strides = array<i32>} : memref<1x3xf32, #tpu.memory_space<vmem>>, vector<1x3xf32>,
    return
  }
}

</mosaic_0001>

<bundles_post_ra>
// kernel: forward.1
= control target key start
LH: loop header
LB: loop body
LE: loop exit
PB: predicated region body
PF: predicated region fallthrough
CT: control target
= control target key end

     0   :  { %s94_s0 = inlined_call_operand.vmem [shape: f32[1,3], index: 0, kind: input, shape index: {}]   ;;  %s95_s1 = inlined_call_operand.vmem [shape: f32[2,3], index: 1, kind: input, shape index: {}]   ;;  %s96_s2 = inlined_call_operand.hbm [shape: f32[1,3], index: 2, kind: output, shape index: {}]  }
   0x1   :  { %v12_v0 = vld [vmem:[%s94_s0] sm:$0x1] }
   0x2   :  { %v15_v1 = vsub.f32 0.0, %v12_v0 }
   0x3   :  { %7 = vsyncpa [#allocation3], 0  ;;  %v14_v5 = vld [vmem:[%s95_s1 + $0x1] sm:$0x1]  ;;  %v13_v7 = vld [vmem:[%s95_s1] sm:$0x1] }
   0x4   :  { %v16_v2 = vmul.f32 1.442695, %v15_v1  ;;  %s66_s15 = smov [#allocation2]   ;;  %vm23_vm0 = vcmask 16384  }
   0x5   :  { %s31_s16 = sshll.u32 %s66_s15, 4  ;;  %s32_s16 = int_to_ptr.vmem [resolvable:$true] %s31_s16 }
   0x6   :  { %40 = vpow2.f32 %v16_v2  ;;  %s44_s0 = scalar_lea.vmem %s32_s16, 16  ;;  %s48_s17 = scalar_lea.vmem %s32_s16, 32 }
   0x7   :  { %p45_p0 = scmp.ne.s32.totalorder %s32_s16, %s44_s0  ;;  %p49_p1 = scmp.lt.s32.totalorder %s32_s16, %s32_s16 }
   0x8   :  { %p50_p2 = scmp.lt.s32.totalorder %s48_s17, %s44_s0 }
   0xa   :  { %p51_p3 = por %p50_p2, %p49_p1 }
   0xc   :  { %p52_p4 = pnand %p51_p3, %p45_p0 }
  0x13   :  { %v41_v3 = vpop.eup %40 }
  0x14   :  { %v18_v4 = vadd.f32 1.0, %v41_v3 }
  0x16   :  { %42 = vrcp.f32 %v18_v4 }
  0x23   :  { %v43_v6 = vpop.eup %42 }
  0x24   :  { %v21_v8 = vmul.f32 %v43_v6, %v14_v5 }
  0x26   :  { %v22_v9 = vadd.f32 %v21_v8, %v13_v7 }
  0x28   :  { %24 = vst.msk [vmem:[#allocation2] sm:$0x1] %vm23_vm0, %v22_v9 }
  0x29   :  { %55 = shalt.err (!%p52_p4)
}
  0x2a   :  { %34 = dma.vmem_to_hbm [thread:$0]  %s32_s16, 16, %s96_s2, [#allocation3]  }
  0x2b   :  { %64 = dma.done.wait [#allocation3], 16  }
  0x2c   :  { %65 = vsyncadd [#allocation3], 4294967280 }
  0x2d   :  { %38 = vsyncpa [#allocation3], 1 }

</bundles_post_ra>
